<compile_context>
chip_gen: v5e
topology: v5e:2x2
jax: 0.10.0
libtpu: 0.0.40
codegen_flags: <defaults>
</compile_context>

<pallas_src>
import numpy as np
import jax
import jax.numpy as jnp
from jax.experimental import pallas as pl
from jax.experimental.pallas import tpu as pltpu


def _round_up(x, m):
    return (x + m - 1) // m * m


def _fold_conv3x3(conv_w, bw):
    """Fold a 3x3 SAME conv over a (bw, bw) map into a dense matrix.

    conv_w: (co, ci, 3, 3).  Returns M of shape (ci*bw*bw, co*bw*bw) such that
        y_flat[b, o*bw*bw + ho*bw + wo] = sum_f h_flat[b, f] * M[f, ...]
    with h_flat[b, c*bw*bw + hi*bw + wi] = h[b, c, hi, wi] (PyTorch NCHW flatten).
    """
    w_np = np.asarray(conv_w, dtype=np.float32)
    co, ci, kh, kw = w_np.shape
    npix = bw * bw
    m = np.zeros((ci * npix, co * npix), dtype=np.float32)
    for o in range(co):
        for c in range(ci):
            for dh in range(kh):
                for dw in range(kw):
                    wv = w_np[o, c, dh, dw]
                    for ho in range(bw):
                        hi = ho + dh - 1
                        if hi < 0 or hi >= bw:
                            continue
                        for wo in range(bw):
                            wi = wo + dw - 1
                            if wi < 0 or wi >= bw:
                                continue
                            m[c * npix + hi * bw + wi,
                              o * npix + ho * bw + wo] += wv
    return jnp.asarray(m)


def prepare_params(params, *, bottom_width=4, bn_eps=1e-5, use_bf16=True,
                   pad_out_lanes=True):
    """One-time wrapper-side folding of all parameters (call once, reuse)."""
    bw = bottom_width
    npix = bw * bw
    f1, zd = params["dense_w"].shape
    ch = params["conv_w"].shape[1]
    assert f1 == ch * npix, (f1, ch, npix)
    f2 = 3 * npix
    mm_dtype = jnp.bfloat16 if use_bf16 else jnp.float32

    # Eval-mode BatchNorm folded to per-channel scale/shift, then both the BN
    # scale and the dense bias folded into the dense weight / a single shift:
    #   (x @ Wd^T + bd) * scale + shift  ==  x @ (Wd^T * scale) + (bd*scale + shift)
    scale_c = (params["bn_gamma"] /
               jnp.sqrt(params["bn_var"] + bn_eps)).astype(jnp.float32)
    shift_c = (params["bn_beta"] - params["bn_mean"] * scale_c).astype(jnp.float32)
    scale = jnp.repeat(scale_c, npix)                                 # (f1,)
    shift = jnp.repeat(shift_c, npix)                                 # (f1,)
    wd_t = jnp.asarray(params["dense_w"], jnp.float32).T * scale[None, :]  # (zd, f1)
    shift_all = (jnp.asarray(params["dense_b"], jnp.float32) * scale
                 + shift).reshape(1, f1)

    # Zero-pad the contraction dim to a full 128-lane width (MXU/load friendly).
    zd_pad = _round_up(zd, 128)
    if zd_pad != zd:
        wd_t = jnp.pad(wd_t, ((0, zd_pad - zd), (0, 0)))
    wd_t = wd_t.astype(mm_dtype)

    # Fold the 3x3 SAME conv over the tiny (bw, bw) map into one matmul matrix,
    # optionally zero-padded to 128 output lanes (unmasked stores / aligned DMA).
    wc = _fold_conv3x3(params["conv_w"], bw)                          # (f1, f2)
    bc = jnp.repeat(jnp.asarray(params["conv_b"], jnp.float32), npix)  # (f2,)
    f2_pad = _round_up(f2, 128) if pad_out_lanes else f2
    if f2_pad != f2:
        wc = jnp.pad(wc, ((0, 0), (0, f2_pad - f2)))
        bc = jnp.pad(bc, (0, f2_pad - f2))
    wc = wc.astype(mm_dtype)
    bc = bc.reshape(1, f2_pad)

    return dict(wd=wd_t, shift=shift_all, wc=wc, bc=bc,
                zd=zd, zd_pad=zd_pad, f1=f1, f2=f2, f2_pad=f2_pad,
                npix=npix, bw=bw, mm_dtype=mm_dtype)


def _generator_kernel(x_ref, wd_ref, shift_ref, wc_ref, bc_ref, o_ref):
    # Dense (BN scale folded into weight), f32 accumulation on the MXU.
    h = jnp.dot(x_ref[...], wd_ref[...], preferred_element_type=jnp.float32)
    # Folded dense-bias + BN-shift, then ReLU (single VPU pass).
    h = jnp.maximum(h + shift_ref[...], 0.0)
    # Folded 3x3 conv as one matmul + bias, then tanh (EUP).
    y = jnp.dot(h.astype(wc_ref.dtype), wc_ref[...],
                preferred_element_type=jnp.float32)
    y = jnp.tanh(y + bc_ref[...])
    o_ref[...] = y.astype(o_ref.dtype)


def _choose_tm(B, block_b):
    """Batch tile: large (amortize ~0.35us/step), multiple of 256 for big B,
    and >= 2 grid steps for large batches so both v7x TensorCores get work."""
    block_b = max(256, _round_up(block_b, 256))
    if B <= 256:
        return _round_up(max(B, 8), 8)      # single small tile
    half = _round_up((B + 1) // 2, 256)
    return min(block_b, half)


def base_generator_forward(x, prepared, *, block_b=2048, out_dtype=jnp.float32):
    """Forward pass of BaseGenerator (empty `blocks`, eval-mode BatchNorm).

    x:        (B, z_dim) latent codes.
    prepared: output of prepare_params().
    Returns (B, 3, bottom_width, bottom_width) in out_dtype.
    """
    bw, npix = prepared["bw"], prepared["npix"]
    zd, zd_pad = prepared["zd"], prepared["zd_pad"]
    f1, f2, f2_pad = prepared["f1"], prepared["f2"], prepared["f2_pad"]
    mm_dtype = prepared["mm_dtype"]

    B = x.shape[0]
    assert x.shape[1] == zd, (x.shape, zd)

    tm = _choose_tm(B, block_b)
    bp = _round_up(B, tm)

    xp = x.astype(mm_dtype)
    if bp != B or zd_pad != zd:
        xp = jnp.pad(xp, ((0, bp - B), (0, zd_pad - zd)))

    itemsize = jnp.dtype(mm_dtype).itemsize
    out_itemsize = jnp.dtype(out_dtype).itemsize
    cost = pl.CostEstimate(
        flops=2 * bp * (zd_pad * f1 + f1 * f2_pad),
        transcendentals=bp * f2_pad,
        bytes_accessed=bp * zd_pad * itemsize
        + (zd_pad * f1 + f1 * f2_pad) * itemsize
        + (f1 + f2_pad) * 4
        + bp * f2_pad * out_itemsize,
    )

    out = pl.pallas_call(
        _generator_kernel,
        out_shape=jax.ShapeDtypeStruct((bp, f2_pad), out_dtype),
        grid=(bp // tm,),
        in_specs=[
            pl.BlockSpec((tm, zd_pad), lambda i: (i, 0)),   # x tile (pipelined)
            pl.BlockSpec((zd_pad, f1), lambda i: (0, 0)),   # dense weight (VMEM-resident)
            pl.BlockSpec((1, f1), lambda i: (0, 0)),        # folded bias+BN shift
            pl.BlockSpec((f1, f2_pad), lambda i: (0, 0)),   # folded conv weight
            pl.BlockSpec((1, f2_pad), lambda i: (0, 0)),    # conv bias
        ],
        out_specs=pl.BlockSpec((tm, f2_pad), lambda i: (i, 0)),
        compiler_params=pltpu.CompilerParams(
            dimension_semantics=("parallel",),
            vmem_limit_bytes=32 * 1024 * 1024),
        cost_estimate=cost,
    )(xp, prepared["wd"], prepared["shift"], prepared["wc"], prepared["bc"])

    # Columns 0..f2-1 are laid out o*npix + h*bw + w, matching NCHW flatten.
    return out[:B, :f2].reshape(B, 3, bw, bw)


def reference_forward(x, params, *, bottom_width=4, bn_eps=1e-5):
    """Pure-JAX reference with the same semantics (eval-mode BN)."""
    bw = bottom_width
    B = x.shape[0]
    h = x @ params["dense_w"].T + params["dense_b"]
    h = h.reshape(B, -1, bw, bw)
    h = (h - params["bn_mean"][None, :, None, None]) / jnp.sqrt(
        params["bn_var"][None, :, None, None] + bn_eps)
    h = (h * params["bn_gamma"][None, :, None, None]
         + params["bn_beta"][None, :, None, None])
    h = jnp.maximum(h, 0.0)
    y = jax.lax.conv_general_dilated(
        h, params["conv_w"], window_strides=(1, 1), padding="SAME",
        dimension_numbers=("NCHW", "OIHW", "NCHW"))
    y = y + params["conv_b"][None, :, None, None]
    return jnp.tanh(y)


if __name__ == "__main__":
    z_dim, ch, bw = 32, 32, 4
    B = 8
    npix = bw * bw
    f1 = ch * npix

    key = jax.random.PRNGKey(0)
    ks = jax.random.split(key, 9)

    x = jax.random.normal(ks[0], (B, z_dim), dtype=jnp.float32)

    # nn.Linear(z_dim, bw*bw*ch) with xavier_uniform_(gain=1.0) weight.
    xav = (6.0 / (z_dim + f1)) ** 0.5
    dense_w = jax.random.uniform(ks[1], (f1, z_dim), jnp.float32, -xav, xav)
    bb = 1.0 / (z_dim ** 0.5)
    dense_b = jax.random.uniform(ks[2], (f1,), jnp.float32, -bb, bb)

    # BatchNorm2d(ch) eval-mode affine + running stats (randomized so the
    # folded scale/shift path is actually exercised).
    bn_gamma = jax.random.uniform(ks[3], (ch,), jnp.float32, 0.5, 1.5)
    bn_beta = 0.1 * jax.random.normal(ks[4], (ch,), dtype=jnp.float32)
    bn_mean = 0.1 * jax.random.normal(ks[5], (ch,), dtype=jnp.float32)
    bn_var = jax.random.uniform(ks[6], (ch,), jnp.float32, 0.5, 1.5)

    # Conv2d(ch, 3, kernel_size=3, padding=1) with xavier_uniform_(gain=1.0).
    fan_in, fan_out = ch * 9, 3 * 9
    xavc = (6.0 / (fan_in + fan_out)) ** 0.5
    conv_w = jax.random.uniform(ks[7], (3, ch, 3, 3), jnp.float32, -xavc, xavc)
    cb = 1.0 / (fan_in ** 0.5)
    conv_b = jax.random.uniform(ks[8], (3,), jnp.float32, -cb, cb)

    params = dict(dense_w=dense_w, dense_b=dense_b, bn_gamma=bn_gamma,
                  bn_beta=bn_beta, bn_mean=bn_mean, bn_var=bn_var,
                  conv_w=conv_w, conv_b=conv_b)

    ref = reference_forward(x, params, bottom_width=bw)

    # f32 matmul-operand path, lane-padded output: tight semantics check.
    prep_f32 = prepare_params(params, bottom_width=bw, use_bf16=False,
                              pad_out_lanes=True)
    out_f32 = jax.block_until_ready(base_generator_forward(x, prep_f32))
    assert out_f32.shape == (B, 3, bw, bw), out_f32.shape
    assert jnp.allclose(out_f32, ref, atol=1e-4, rtol=1e-4), "f32 mismatch"

    # bf16 matmul-operand path (halves the dominant weight/input HBM streams).
    prep_bf16 = prepare_params(params, bottom_width=bw, use_bf16=True,
                               pad_out_lanes=True)
    out_bf16 = jax.block_until_ready(base_generator_forward(x, prep_bf16))
    assert out_bf16.shape == (B, 3, bw, bw), out_bf16.shape
    assert jnp.allclose(out_bf16, ref, atol=5e-2, rtol=5e-2), "bf16 mismatch"

    # Narrow (48-lane) output variant, e.g. for write-bound v5e: still correct.
    prep_narrow = prepare_params(params, bottom_width=bw, use_bf16=False,
                                 pad_out_lanes=False)
    out_narrow = jax.block_until_ready(base_generator_forward(x, prep_narrow))
    assert jnp.allclose(out_narrow, ref, atol=1e-4, rtol=1e-4), "narrow mismatch"

    print("KERNEL_OK")
</pallas_src>

<mosaic_0001>
module attributes {stable_mosaic.version = 11 : i64} {
  func.func @_generator_kernel(%arg0: i32, %arg1: memref<8x128xf32, #tpu.memory_space<vmem>>, %arg2: memref<128x512xf32, #tpu.memory_space<vmem>>, %arg3: memref<1x512xf32, #tpu.memory_space<vmem>>, %arg4: memref<512x128xf32, #tpu.memory_space<vmem>>, %arg5: memref<1x128xf32, #tpu.memory_space<vmem>>, %arg6: memref<8x128xf32, #tpu.memory_space<vmem>>) attributes {dimension_semantics = [#tpu.dimension_semantics<parallel>], iteration_bounds = array<i64: 1>, scalar_prefetch = 0 : i64, scratch_operands = 0 : i64, tpu.core_type = #tpu.core_type<tc>, window_params = [{transform_indices = @transform_0, window_bounds = array<i64: 8, 128>}, {pipeline_mode = #tpu.pipeline_mode<synchronous>, transform_indices = @transform_1, window_bounds = array<i64: 128, 512>}, {pipeline_mode = #tpu.pipeline_mode<synchronous>, transform_indices = @transform_2, window_bounds = array<i64: 1, 512>}, {pipeline_mode = #tpu.pipeline_mode<synchronous>, transform_indices = @transform_3, window_bounds = array<i64: 512, 128>}, {pipeline_mode = #tpu.pipeline_mode<synchronous>, transform_indices = @transform_4, window_bounds = array<i64: 1, 128>}, {transform_indices = @transform_5, window_bounds = array<i64: 8, 128>}]} {
    %c0 = arith.constant 0 : index
    %c0_0 = arith.constant 0 : index
    %0 = vector.load %arg1[%c0, %c0_0] : memref<8x128xf32, #tpu.memory_space<vmem>>, vector<8x128xf32>
    %c0_1 = arith.constant 0 : index
    %c0_2 = arith.constant 0 : index
    %1 = vector.load %arg2[%c0_1, %c0_2] : memref<128x512xf32, #tpu.memory_space<vmem>>, vector<128x512xf32>
    %cst = arith.constant dense<0.000000e+00> : vector<8x512xf32>
    %2 = tpu.matmul %0, %1, %cst {dimension_numbers = #tpu.dot_dimension_numbers<[1], [0], [0], [1], [0, 0, 1, 1], [], []>} : vector<8x128xf32>, vector<128x512xf32>, vector<8x512xf32> -> vector<8x512xf32>
    %c0_3 = arith.constant 0 : index
    %c0_4 = arith.constant 0 : index
    %3 = vector.load %arg3[%c0_3, %c0_4] : memref<1x512xf32, #tpu.memory_space<vmem>>, vector<1x512xf32>
    %4 = vector.broadcast %3 : vector<1x512xf32> to vector<8x512xf32>
    %5 = arith.addf %2, %4 : vector<8x512xf32>
    %cst_5 = arith.constant 0.000000e+00 : f32
    %6 = vector.broadcast %cst_5 : f32 to vector<8x512xf32>
    %7 = arith.maximumf %5, %6 : vector<8x512xf32>
    %c0_6 = arith.constant 0 : index
    %c0_7 = arith.constant 0 : index
    %8 = vector.load %arg4[%c0_6, %c0_7] : memref<512x128xf32, #tpu.memory_space<vmem>>, vector<512x128xf32>
    %cst_8 = arith.constant dense<0.000000e+00> : vector<8x128xf32>
    %9 = tpu.matmul %7, %8, %cst_8 {dimension_numbers = #tpu.dot_dimension_numbers<[1], [0], [0], [1], [0, 0, 1, 1], [], []>} : vector<8x512xf32>, vector<512x128xf32>, vector<8x128xf32> -> vector<8x128xf32>
    %c0_9 = arith.constant 0 : index
    %c0_10 = arith.constant 0 : index
    %10 = vector.load %arg5[%c0_9, %c0_10] : memref<1x128xf32, #tpu.memory_space<vmem>>, vector<1x128xf32>
    %11 = vector.broadcast %10 : vector<1x128xf32> to vector<8x128xf32>
    %12 = arith.addf %9, %11 : vector<8x128xf32>
    %13 = math.tanh %12 : vector<8x128xf32>
    %c0_11 = arith.constant 0 : index
    %c0_12 = arith.constant 0 : index
    %14 = vector.load %arg6[%c0_11, %c0_12] : memref<8x128xf32, #tpu.memory_space<vmem>>, vector<8x128xf32>
    tpu.vector_store %arg6[%c0_11, %c0_12], %13 {strides = array<i32>} : memref<8x128xf32, #tpu.memory_space<vmem>>, vector<8x128xf32>,
    return
  }
  func.func @transform_0(%arg0: i32) -> (i32, i32) {
    %c0_i32 = arith.constant 0 : i32
    %c0_i32_0 = arith.constant 0 : i32
    return %arg0, %c0_i32 : i32, i32
  }
  func.func @transform_1(%arg0: i32) -> (i32, i32) {
    %c0_i32 = arith.constant 0 : i32
    %c0_i32_0 = arith.constant 0 : i32
    %c0_i32_1 = arith.constant 0 : i32
    return %c0_i32, %c0_i32_0 : i32, i32
  }
  func.func @transform_2(%arg0: i32) -> (i32, i32) {
    %c0_i32 = arith.constant 0 : i32
    %c0_i32_0 = arith.constant 0 : i32
    %c0_i32_1 = arith.constant 0 : i32
    return %c0_i32, %c0_i32_0 : i32, i32
  }
  func.func @transform_3(%arg0: i32) -> (i32, i32) {
    %c0_i32 = arith.constant 0 : i32
    %c0_i32_0 = arith.constant 0 : i32
    %c0_i32_1 = arith.constant 0 : i32
    return %c0_i32, %c0_i32_0 : i32, i32
  }
  func.func @transform_4(%arg0: i32) -> (i32, i32) {
    %c0_i32 = arith.constant 0 : i32
    %c0_i32_0 = arith.constant 0 : i32
    %c0_i32_1 = arith.constant 0 : i32
    return %c0_i32, %c0_i32_0 : i32, i32
  }
  func.func @transform_5(%arg0: i32) -> (i32, i32) {
    %c0_i32 = arith.constant 0 : i32
    %c0_i32_0 = arith.constant 0 : i32
    return %arg0, %c0_i32 : i32, i32
  }
}

</mosaic_0001>

<bundles_post_ra>
// kernel: tpu_custom_call.1
= control target key start
LH: loop header
LB: loop body
LE: loop exit
PB: predicated region body
PF: predicated region fallthrough
CT: control target
= control target key end

     0   :  { %10 = vsyncpa [#allocation3], 0  ;;  %s605_s0 = inlined_call_operand.hbm [shape: f32[8,128], index: 0, kind: input, shape index: {}]   ;;  %s606_s1 = inlined_call_operand.hbm [shape: f32[128,512], index: 1, kind: input, shape index: {}]   ;;  %s607_s2 = inlined_call_operand.hbm [shape: f32[1,512], index: 2, kind: input, shape index: {}]   ;;  %s608_s3 = inlined_call_operand.hbm [shape: f32[512,128], index: 3, kind: input, shape index: {}]   ;;  %s609_s4 = inlined_call_operand.vmem [shape: f32[1,128], index: 4, kind: input, shape index: {}]   ;;  %s610_s5 = inlined_call_operand.hbm [shape: f32[8,128], index: 5, kind: output, shape index: {}]  }
   0x1   :  { %11 = vsyncpa [#allocation6], 0 }
   0x2   :  { %12 = vsyncpa [#allocation9], 0  ;;  %s29_s20 = sshll.u32 %s606_s1, 4  ;;  %s30_s20 = int_to_ptr.hbm [resolvable:$true] %s29_s20 }
   0x3   :  { %13 = vsyncpa [#allocation4], 0  ;;  %s548_s21 = smov [#allocation5]   ;;  %s19_s25 = sshll.u32 %s605_s0, 4  ;;  %s20_s25 = int_to_ptr.hbm [resolvable:$true] %s19_s25 }
   0x4   :  { %s31_s22 = sshll.u32 %s548_s21, 4  ;;  %s549_s26 = smov 512   ;;  %s32_s22 = int_to_ptr.vmem [resolvable:$true] %s31_s22 }
   0x5   :  { %s550_s27 = smov 32   ;;  %s551_s28 = smov [#allocation2]  }
   0x6   :  { %37 = dma.hbm_to_vmem [thread:$0]  %s30_s20, 8192, %s32_s22, [#allocation6], %s549_s26, %s549_s26, %s550_s27  }
   0x7   :  { %s21_s29 = sshll.u32 %s551_s28, 4  ;;  %s43_s7 = sshll.u32 %s607_s2, 4  ;;  %s22_s29 = int_to_ptr.vmem [resolvable:$true] %s21_s29  ;;  %s44_s7 = int_to_ptr.hbm [resolvable:$true] %s43_s7 }
   0x8   :  { %24 = dma.hbm_to_vmem [thread:$0]  %s20_s25, 128, %s22_s29, [#allocation3]  }
   0x9   :  { %s53_s9 = sshll.u32 %s608_s3, 4  ;;  %s552_s10 = smov [#allocation7]   ;;  %s54_s9 = int_to_ptr.hbm [resolvable:$true] %s53_s9 }
   0xa   :  { %s45_s11 = sshll.u32 %s552_s10, 4  ;;  %s553_s0 = smov [#allocation8]   ;;  %s46_s11 = int_to_ptr.vmem [resolvable:$true] %s45_s11 }
   0xb   :  { %48 = dma.hbm_to_vmem [thread:$0]  %s44_s7, 64, %s46_s11, [#allocation6]  }
   0xc   :  { %s55_s12 = sshll.u32 %s553_s0, 4  ;;  %s554_s13 = smov 128   ;;  %s56_s12 = int_to_ptr.vmem [resolvable:$true] %s55_s12 }
   0xd   :  { %s555_s14 = smov 8  }
   0xe   :  { %61 = dma.hbm_to_vmem [thread:$0]  %s54_s9, 8192, %s56_s12, [#allocation9], %s554_s13, %s554_s13, %s555_s14  }
   0xf   :  { %540 = dma.done.wait [#allocation3], 128  }
  0x10   :  { %541 = vsyncadd [#allocation3], 4294967168 }
  0x11   :  { %542 = dma.done.wait [#allocation6], 8256  }
  0x12   :  { %543 = vsyncadd [#allocation6], 4294959040 }
  0x13   :  { %544 = dma.done.wait [#allocation9], 8192  }
  0x14   :  { %545 = vsyncadd [#allocation9], 4294959104  ;;  %v143_v0 = vld [vmem:[#allocation5 + $0x1f0] sm:$0xff]  ;;  %v144_v2 = vld [vmem:[#allocation5 + $0x1f8] sm:$0xff]  ;;  %s556_s15 = smov [#allocation10]   ;;  %s396_s19 = sshll.u32 %s610_s5, 4  ;;  %s397_s19 = int_to_ptr.hbm [resolvable:$true] %s396_s19 }
  0x15   :  { %v139_v1 = vld [vmem:[#allocation5 + $0x1d0] sm:$0xff]  ;;  %195 = vmatpush.msra.mxu2 %v143_v0  ;;  %215 = vmatpush.msra.mxu3 %v144_v2  ;;  %v140_v3 = vld [vmem:[#allocation5 + $0x1d8] sm:$0xff]  ;;  %v141_v6 = vld [vmem:[#allocation5 + $0x1e0] sm:$0xff]  ;;  %s394_s16 = sshll.u32 %s556_s15, 4  ;;  %s395_s16 = int_to_ptr.vmem [resolvable:$true] %s394_s16 }
  0x16   :  { %v135_v4 = vld [vmem:[#allocation5 + $0x1b0] sm:$0xff]  ;;  %v136_v5 = vld [vmem:[#allocation5 + $0x1b8] sm:$0xff]  ;;  %v137_v7 = vld [vmem:[#allocation5 + $0x1c0] sm:$0xff]  ;;  %155 = vmatpush.msra.mxu0 %v141_v6 }
  0x17   :  { %196 = vmatpush.msra.mxu2 %v139_v1  ;;  %216 = vmatpush.msra.mxu3 %v140_v3  ;;  %v142_v8 = vld [vmem:[#allocation5 + $0x1e8] sm:$0xff]  ;;  %v131_v9 = vld [vmem:[#allocation5 + $0x190] sm:$0xff]  ;;  %v132_v10 = vld [vmem:[#allocation5 + $0x198] sm:$0xff] }
  0x18   :  { %175 = vmatpush.msra.mxu1 %v142_v8  ;;  %v133_v11 = vld [vmem:[#allocation5 + $0x1a0] sm:$0xff]  ;;  %v138_v12 = vld [vmem:[#allocation5 + $0x1c8] sm:$0xff]  ;;  %v127_v13 = vld [vmem:[#allocation5 + $0x170] sm:$0xff]  ;;  %156 = vmatpush.msra.mxu0 %v137_v7 }
  0x19   :  { %197 = vmatpush.msra.mxu2 %v135_v4  ;;  %217 = vmatpush.msra.mxu3 %v136_v5  ;;  %v128_v14 = vld [vmem:[#allocation5 + $0x178] sm:$0xff]  ;;  %v134_v15 = vld [vmem:[#allocation5 + $0x1a8] sm:$0xff]  ;;  %v129_v16 = vld [vmem:[#allocation5 + $0x180] sm:$0xff] }
  0x1a   :  { %176 = vmatpush.msra.mxu1 %v138_v12  ;;  %v130_v17 = vld [vmem:[#allocation5 + $0x188] sm:$0xff]  ;;  %v123_v18 = vld [vmem:[#allocation5 + $0x150] sm:$0xff]  ;;  %157 = vmatpush.msra.mxu0 %v133_v11  ;;  %v124_v19 = vld [vmem:[#allocation5 + $0x158] sm:$0xff] }
  0x1b   :  { %198 = vmatpush.msra.mxu2 %v131_v9  ;;  %218 = vmatpush.msra.mxu3 %v132_v10  ;;  %v125_v20 = vld [vmem:[#allocation5 + $0x160] sm:$0xff]  ;;  %v126_v21 = vld [vmem:[#allocation5 + $0x168] sm:$0xff]  ;;  %v119_v22 = vld [vmem:[#allocation5 + $0x130] sm:$0xff] }
  0x1c   :  { %177 = vmatpush.msra.mxu1 %v134_v15  ;;  %158 = vmatpush.msra.mxu0 %v129_v16  ;;  %v120_v23 = vld [vmem:[#allocation5 + $0x138] sm:$0xff]  ;;  %v121_v24 = vld [vmem:[#allocation5 + $0x140] sm:$0xff]  ;;  %v122_v25 = vld [vmem:[#allocation5 + $0x148] sm:$0xff] }
  0x1d   :  { %199 = vmatpush.msra.mxu2 %v127_v13  ;;  %219 = vmatpush.msra.mxu3 %v128_v14  ;;  %v115_v26 = vld [vmem:[#allocation5 + $0x110] sm:$0xff]  ;;  %v116_v27 = vld [vmem:[#allocation5 + $0x118] sm:$0xff]  ;;  %v117_v28 = vld [vmem:[#allocation5 + $0x120] sm:$0xff] }
  0x1e   :  { %178 = vmatpush.msra.mxu1 %v130_v17  ;;  %159 = vmatpush.msra.mxu0 %v125_v20  ;;  %v118_v29 = vld [vmem:[#allocation5 + $0x128] sm:$0xff]  ;;  %v111_v30 = vld [vmem:[#allocation5 + $0xf0] sm:$0xff]  ;;  %v112_v31 = vld [vmem:[#allocation5 + $0xf8] sm:$0xff] }
  0x1f   :  { %200 = vmatpush.msra.mxu2 %v123_v18  ;;  %220 = vmatpush.msra.mxu3 %v124_v19  ;;  %v113_v32 = vld [vmem:[#allocation5 + $0x100] sm:$0xff]  ;;  %v114_v33 = vld [vmem:[#allocation5 + $0x108] sm:$0xff]  ;;  %v107_v34 = vld [vmem:[#allocation5 + $0xd0] sm:$0xff] }
  0x20   :  { %179 = vmatpush.msra.mxu1 %v126_v21  ;;  %160 = vmatpush.msra.mxu0 %v121_v24  ;;  %v108_v35 = vld [vmem:[#allocation5 + $0xd8] sm:$0xff]  ;;  %v109_v36 = vld [vmem:[#allocation5 + $0xe0] sm:$0xff]  ;;  %v110_v37 = vld [vmem:[#allocation5 + $0xe8] sm:$0xff] }
  0x21   :  { %201 = vmatpush.msra.mxu2 %v119_v22  ;;  %221 = vmatpush.msra.mxu3 %v120_v23  ;;  %v103_v38 = vld [vmem:[#allocation5 + $0xb0] sm:$0xff]  ;;  %v104_v39 = vld [vmem:[#allocation5 + $0xb8] sm:$0xff]  ;;  %v105_v40 = vld [vmem:[#allocation5 + $0xc0] sm:$0xff] }
  0x22   :  { %180 = vmatpush.msra.mxu1 %v122_v25  ;;  %161 = vmatpush.msra.mxu0 %v117_v28  ;;  %v106_v41 = vld [vmem:[#allocation5 + $0xc8] sm:$0xff]  ;;  %v99_v42 = vld [vmem:[#allocation5 + $0x90] sm:$0xff]  ;;  %v100_v43 = vld [vmem:[#allocation5 + $0x98] sm:$0xff] }
  0x23   :  { %202 = vmatpush.msra.mxu2 %v115_v26  ;;  %222 = vmatpush.msra.mxu3 %v116_v27  ;;  %v101_v44 = vld [vmem:[#allocation5 + $0xa0] sm:$0xff]  ;;  %v102_v45 = vld [vmem:[#allocation5 + $0xa8] sm:$0xff]  ;;  %v95_v46 = vld [vmem:[#allocation5 + $0x70] sm:$0xff] }
  0x24   :  { %181 = vmatpush.msra.mxu1 %v118_v29  ;;  %162 = vmatpush.msra.mxu0 %v113_v32  ;;  %v96_v47 = vld [vmem:[#allocation5 + $0x78] sm:$0xff]  ;;  %v97_v48 = vld [vmem:[#allocation5 + $0x80] sm:$0xff]  ;;  %v98_v49 = vld [vmem:[#allocation5 + $0x88] sm:$0xff] }
  0x25   :  { %203 = vmatpush.msra.mxu2 %v111_v30  ;;  %223 = vmatpush.msra.mxu3 %v112_v31  ;;  %v91_v50 = vld [vmem:[#allocation5 + $0x50] sm:$0xff]  ;;  %v92_v51 = vld [vmem:[#allocation5 + $0x58] sm:$0xff]  ;;  %v93_v52 = vld [vmem:[#allocation5 + $0x60] sm:$0xff] }
  0x26   :  { %182 = vmatpush.msra.mxu1 %v114_v33  ;;  %163 = vmatpush.msra.mxu0 %v109_v36  ;;  %v94_v53 = vld [vmem:[#allocation5 + $0x68] sm:$0xff]  ;;  %v87_v54 = vld [vmem:[#allocation5 + $0x30] sm:$0xff]  ;;  %v88_v55 = vld [vmem:[#allocation5 + $0x38] sm:$0xff] }
  0x27   :  { %204 = vmatpush.msra.mxu2 %v107_v34  ;;  %224 = vmatpush.msra.mxu3 %v108_v35  ;;  %v89_v56 = vld [vmem:[#allocation5 + $0x40] sm:$0xff]  ;;  %v90_v57 = vld [vmem:[#allocation5 + $0x48] sm:$0xff]  ;;  %v83_v58 = vld [vmem:[#allocation5 + $0x10] sm:$0xff] }
  0x28   :  { %183 = vmatpush.msra.mxu1 %v110_v37  ;;  %164 = vmatpush.msra.mxu0 %v105_v40  ;;  %v84_v59 = vld [vmem:[#allocation5 + $0x18] sm:$0xff]  ;;  %v85_v61 = vld [vmem:[#allocation5 + $0x20] sm:$0xff]  ;;  %v86_v62 = vld [vmem:[#allocation5 + $0x28] sm:$0xff] }
  0x29   :  { %205 = vmatpush.msra.mxu2 %v103_v38  ;;  %225 = vmatpush.msra.mxu3 %v104_v39  ;;  %v80_v60 = vld [vmem:[#allocation2] sm:$0xff]  ;;  %v81_v1 = vld [vmem:[#allocation5] sm:$0xff]  ;;  %v82_v2 = vld [vmem:[#allocation5 + $0x8] sm:$0xff] }
  0x2a   :  { %184 = vmatpush.msra.mxu1 %v106_v41  ;;  %165 = vmatpush.msra.mxu0 %v101_v44  ;;  %v286_v63 = vld [vmem:[#allocation8 + $0x178] sm:$0xff]  ;;  %v285_v4 = vld [vmem:[#allocation8 + $0x170] sm:$0xff]  ;;  %v284_v8 = vld [vmem:[#allocation8 + $0x168] sm:$0xff] }
  0x2b   :  { %206 = vmatpush.msra.mxu2 %v99_v42  ;;  %226 = vmatpush.msra.mxu3 %v100_v43  ;;  %v302_v0 = vld [vmem:[#allocation8 + $0x1f8] sm:$0xff]  ;;  %v301_v6 = vld [vmem:[#allocation8 + $0x1f0] sm:$0xff]  ;;  %v300_v10 = vld [vmem:[#allocation8 + $0x1e8] sm:$0xff] }
  0x2c   :  { %185 = vmatpush.msra.mxu1 %v102_v45  ;;  %166 = vmatpush.msra.mxu0 %v97_v48  ;;  %v254_v3 = vld [vmem:[#allocation8 + $0x78] sm:$0xff]  ;;  %v253_v7 = vld [vmem:[#allocation8 + $0x70] sm:$0xff]  ;;  %v252_v11 = vld [vmem:[#allocation8 + $0x68] sm:$0xff] }
  0x2d   :  { %207 = vmatpush.msra.mxu2 %v95_v46  ;;  %227 = vmatpush.msra.mxu3 %v96_v47  ;;  %v270_v5 = vld [vmem:[#allocation8 + $0xf8] sm:$0xff]  ;;  %v269_v9 = vld [vmem:[#allocation8 + $0xf0] sm:$0xff]  ;;  %v283_v12 = vld [vmem:[#allocation8 + $0x160] sm:$0xff] }
  0x2e   :  { %186 = vmatpush.msra.mxu1 %v98_v49  ;;  %167 = vmatpush.msra.mxu0 %v93_v52  ;;  %v268_v13 = vld [vmem:[#allocation8 + $0xe8] sm:$0xff]  ;;  %v299_v14 = vld [vmem:[#allocation8 + $0x1e0] sm:$0xff]  ;;  %v282_v16 = vld [vmem:[#allocation8 + $0x158] sm:$0xff] }
  0x2f   :  { %208 = vmatpush.msra.mxu2 %v91_v50  ;;  %228 = vmatpush.msra.mxu3 %v92_v51  ;;  %v251_v15 = vld [vmem:[#allocation8 + $0x60] sm:$0xff]  ;;  %v298_v18 = vld [vmem:[#allocation8 + $0x1d8] sm:$0xff]  ;;  %v281_v20 = vld [vmem:[#allocation8 + $0x150] sm:$0xff] }
  0x30   :  { %187 = vmatpush.msra.mxu1 %v94_v53  ;;  %168 = vmatpush.msra.mxu0 %v89_v56  ;;  %v267_v17 = vld [vmem:[#allocation8 + $0xe0] sm:$0xff]  ;;  %v250_v19 = vld [vmem:[#allocation8 + $0x58] sm:$0xff]  ;;  %v297_v22 = vld [vmem:[#allocation8 + $0x1d0] sm:$0xff] }
  0x31   :  { %209 = vmatpush.msra.mxu2 %v87_v54  ;;  %229 = vmatpush.msra.mxu3 %v88_v55  ;;  %v266_v21 = vld [vmem:[#allocation8 + $0xd8] sm:$0xff]  ;;  %v249_v23 = vld [vmem:[#allocation8 + $0x50] sm:$0xff]  ;;  %v280_v24 = vld [vmem:[#allocation8 + $0x148] sm:$0xff] }
  0x32   :  { %188 = vmatpush.msra.mxu1 %v90_v57  ;;  %169 = vmatpush.msra.mxu0 %v85_v61  ;;  %v265_v25 = vld [vmem:[#allocation8 + $0xd0] sm:$0xff]  ;;  %v296_v26 = vld [vmem:[#allocation8 + $0x1c8] sm:$0xff]  ;;  %v279_v28 = vld [vmem:[#allocation8 + $0x140] sm:$0xff] }
  0x33   :  { %210 = vmatpush.msra.mxu2 %v83_v58  ;;  %230 = vmatpush.msra.mxu3 %v84_v59  ;;  %v248_v27 = vld [vmem:[#allocation8 + $0x48] sm:$0xff]  ;;  %v295_v30 = vld [vmem:[#allocation8 + $0x1c0] sm:$0xff]  ;;  %v278_v32 = vld [vmem:[#allocation8 + $0x138] sm:$0xff] }
  0x34   :  { %211 = vmatmul.f32.vlgmr.msra.gmra.mxu2 %v80_v60  ;;  %231 = vmatmul.f32.vlgmr.msra.gmra.mxu3 %v80_v60  ;;  %v264_v29 = vld [vmem:[#allocation8 + $0xc8] sm:$0xff]  ;;  %v247_v31 = vld [vmem:[#allocation8 + $0x40] sm:$0xff]  ;;  %v294_v34 = vld [vmem:[#allocation8 + $0x1b8] sm:$0xff] }
  0x35   :  { %189 = vmatpush.msra.mxu1 %v86_v62  ;;  %347 = vmatpush.msrb.mxu2 %v286_v63  ;;  %v263_v33 = vld [vmem:[#allocation8 + $0xc0] sm:$0xff]  ;;  %v246_v35 = vld [vmem:[#allocation8 + $0x38] sm:$0xff]  ;;  %v277_v36 = vld [vmem:[#allocation8 + $0x130] sm:$0xff] }
  0x36   :  { %367 = vmatpush.msrb.mxu3 %v302_v0  ;;  %170 = vmatpush.msra.mxu0 %v81_v1  ;;  %v262_v37 = vld [vmem:[#allocation8 + $0xb8] sm:$0xff]  ;;  %v293_v38 = vld [vmem:[#allocation8 + $0x1b0] sm:$0xff]  ;;  %v276_v40 = vld [vmem:[#allocation8 + $0x128] sm:$0xff] }
  0x37   :  { %190 = vmatpush.msra.mxu1 %v82_v2  ;;  %171 = vmatmul.f32.vlgmr.msra.gmra.mxu0 %v80_v60  ;;  %v245_v39 = vld [vmem:[#allocation8 + $0x30] sm:$0xff]  ;;  %v292_v42 = vld [vmem:[#allocation8 + $0x1a8] sm:$0xff]  ;;  %v275_v44 = vld [vmem:[#allocation8 + $0x120] sm:$0xff] }
  0x38   :  { %191 = vmatmul.f32.vlgmr.msra.gmra.mxu1 %v80_v60  ;;  %307 = vmatpush.msrb.mxu0 %v254_v3  ;;  %v261_v41 = vld [vmem:[#allocation8 + $0xb0] sm:$0xff]  ;;  %v244_v43 = vld [vmem:[#allocation8 + $0x28] sm:$0xff]  ;;  %v291_v46 = vld [vmem:[#allocation8 + $0x1a0] sm:$0xff] }
  0x39   :  { %348 = vmatpush.msrb.mxu2 %v285_v4  ;;  %327 = vmatpush.msrb.mxu1 %v270_v5  ;;  %v260_v45 = vld [vmem:[#allocation8 + $0xa8] sm:$0xff]  ;;  %v243_v47 = vld [vmem:[#allocation8 + $0x20] sm:$0xff]  ;;  %v274_v48 = vld [vmem:[#allocation8 + $0x118] sm:$0xff] }
  0x3a   :  { %368 = vmatpush.msrb.mxu3 %v301_v6  ;;  %308 = vmatpush.msrb.mxu0 %v253_v7  ;;  %v242_v49 = vld [vmem:[#allocation8 + $0x18] sm:$0xff]  ;;  %v259_v50 = vld [vmem:[#allocation8 + $0xa0] sm:$0xff]  ;;  %v273_v51 = vld [vmem:[#allocation8 + $0x110] sm:$0xff] }
  0x3b   :  { %349 = vmatpush.msrb.mxu2 %v284_v8  ;;  %328 = vmatpush.msrb.mxu1 %v269_v9  ;;  %v290_v52 = vld [vmem:[#allocation8 + $0x198] sm:$0xff]  ;;  %v241_v53 = vld [vmem:[#allocation8 + $0x10] sm:$0xff]  ;;  %v272_v55 = vld [vmem:[#allocation8 + $0x108] sm:$0xff] }
  0x3c   :  { %369 = vmatpush.msrb.mxu3 %v300_v10  ;;  %309 = vmatpush.msrb.mxu0 %v252_v11  ;;  %v258_v54 = vld [vmem:[#allocation8 + $0x98] sm:$0xff]  ;;  %v289_v56 = vld [vmem:[#allocation8 + $0x190] sm:$0xff]  ;;  %v240_v57 = vld [vmem:[#allocation8 + $0x8] sm:$0xff] }
  0x3d   :  { %350 = vmatpush.msrb.mxu2 %v283_v12  ;;  %329 = vmatpush.msrb.mxu1 %v268_v13  ;;  %v257_v58 = vld [vmem:[#allocation8 + $0x90] sm:$0xff]  ;;  %v271_v59 = vld [vmem:[#allocation8 + $0x100] sm:$0xff]  ;;  %v288_v60 = vld [vmem:[#allocation8 + $0x188] sm:$0xff] }
  0x3e   :  { %370 = vmatpush.msrb.mxu3 %v299_v14  ;;  %310 = vmatpush.msrb.mxu0 %v251_v15  ;;  %v239_v61 = vld [vmem:[#allocation8] sm:$0xff]  ;;  %v256_v62 = vld [vmem:[#allocation8 + $0x88] sm:$0xff]  ;;  %v145_v1 = vld [vmem:[#allocation7] sm:$0xf] }
  0x3f   :  { %351 = vmatpush.msrb.mxu2 %v282_v16  ;;  %330 = vmatpush.msrb.mxu1 %v267_v17  ;;  %v287_v63 = vld [vmem:[#allocation8 + $0x180] sm:$0xff]  ;;  %v147_v2 = vperm.slane %v145_v1, 0  ;;  %v148_v3 = vperm.slane %v145_v1, 1  ;;  %v149_v4 = vperm.slane %v145_v1, 2  ;;  %v150_v5 = vperm.slane %v145_v1, 3 }
  0x40   :  { %371 = vmatpush.msrb.mxu3 %v298_v18  ;;  %311 = vmatpush.msrb.mxu0 %v250_v19  ;;  %v255_v0 = vld [vmem:[#allocation8 + $0x80] sm:$0xff]  ;;  %v417_v18 = vld [vmem:[%s609_s4] ss:$0 sm:$0xff] }
  0x41   :  { %352 = vmatpush.msrb.mxu2 %v281_v20  ;;  %331 = vmatpush.msrb.mxu1 %v266_v21 }
  0x42   :  { %372 = vmatpush.msrb.mxu3 %v297_v22  ;;  %312 = vmatpush.msrb.mxu0 %v249_v23 }
  0x43   :  { %353 = vmatpush.msrb.mxu2 %v280_v24  ;;  %332 = vmatpush.msrb.mxu1 %v265_v25 }
  0x44   :  { %373 = vmatpush.msrb.mxu3 %v296_v26  ;;  %313 = vmatpush.msrb.mxu0 %v248_v27 }
  0x45   :  { %354 = vmatpush.msrb.mxu2 %v279_v28  ;;  %333 = vmatpush.msrb.mxu1 %v264_v29 }
  0x46   :  { %374 = vmatpush.msrb.mxu3 %v295_v30  ;;  %314 = vmatpush.msrb.mxu0 %v247_v31 }
  0x47   :  { %355 = vmatpush.msrb.mxu2 %v278_v32  ;;  %334 = vmatpush.msrb.mxu1 %v263_v33 }
  0x48   :  { %375 = vmatpush.msrb.mxu3 %v294_v34  ;;  %315 = vmatpush.msrb.mxu0 %v246_v35 }
  0x49   :  { %356 = vmatpush.msrb.mxu2 %v277_v36  ;;  %335 = vmatpush.msrb.mxu1 %v262_v37 }
  0x4a   :  { %376 = vmatpush.msrb.mxu3 %v293_v38  ;;  %316 = vmatpush.msrb.mxu0 %v245_v39 }
  0x4b   :  { %357 = vmatpush.msrb.mxu2 %v276_v40  ;;  %336 = vmatpush.msrb.mxu1 %v261_v41 }
  0x4c   :  { %377 = vmatpush.msrb.mxu3 %v292_v42  ;;  %317 = vmatpush.msrb.mxu0 %v244_v43 }
  0x4d   :  { %358 = vmatpush.msrb.mxu2 %v275_v44  ;;  %337 = vmatpush.msrb.mxu1 %v260_v45 }
  0x4e   :  { %378 = vmatpush.msrb.mxu3 %v291_v46  ;;  %318 = vmatpush.msrb.mxu0 %v243_v47 }
  0x4f   :  { %359 = vmatpush.msrb.mxu2 %v274_v48  ;;  %338 = vmatpush.msrb.mxu1 %v259_v50 }
  0x50   :  { %319 = vmatpush.msrb.mxu0 %v242_v49  ;;  %379 = vmatpush.msrb.mxu3 %v290_v52 }
  0x51   :  { %360 = vmatpush.msrb.mxu2 %v273_v51  ;;  %339 = vmatpush.msrb.mxu1 %v258_v54 }
  0x52   :  { %320 = vmatpush.msrb.mxu0 %v241_v53  ;;  %380 = vmatpush.msrb.mxu3 %v289_v56 }
  0x53   :  { %361 = vmatpush.msrb.mxu2 %v272_v55  ;;  %340 = vmatpush.msrb.mxu1 %v257_v58 }
  0x54   :  { %321 = vmatpush.msrb.mxu0 %v240_v57  ;;  %381 = vmatpush.msrb.mxu3 %v288_v60 }
  0x55   :  { %362 = vmatpush.msrb.mxu2 %v271_v59  ;;  %341 = vmatpush.msrb.mxu1 %v256_v62 }
  0x56   :  { %322 = vmatpush.msrb.mxu0 %v239_v61  ;;  %382 = vmatpush.msrb.mxu3 %v287_v63 }
  0x57   :  { %342 = vmatpush.msrb.mxu1 %v255_v0 }
  0xb4   :  { %v172_v6 = vpop.f32.mrf.mxu0 }
  0xb5   :  { %v192_v7 = vpop.f32.mrf.mxu1  ;;  %v173_v8 = vadd.f32 %v172_v6, %v147_v2 }
  0xb6   :  { %v193_v9 = vadd.f32 %v192_v7, %v148_v3 }
  0xb7   :  { %v212_v10 = vpop.f32.mrf.mxu2  ;;  %v232_v11 = vpop.f32.mrf.mxu3  ;;  %v235_v13 = vmax.f32 %v173_v8, 0.0 }
  0xb8   :  { %v213_v12 = vadd.f32 %v212_v10, %v149_v4  ;;  %v233_v14 = vadd.f32 %v232_v11, %v150_v5  ;;  %v236_v15 = vmax.f32 %v193_v9, 0.0 }
  0xb9   :  { %323 = vmatmul.f32.vlgmr.msrb.gmra.mxu0 %v235_v13 }
  0xba   :  { %v237_v16 = vmax.f32 %v213_v12, 0.0  ;;  %v238_v17 = vmax.f32 %v233_v14, 0.0  ;;  %343 = vmatmul.f32.vlgmr.msrb.gmra.mxu1 %v236_v15 }
  0xbc   :  { %363 = vmatmul.f32.vlgmr.msrb.gmra.mxu2 %v237_v16  ;;  %383 = vmatmul.f32.vlgmr.msrb.gmra.mxu3 %v238_v17 }
 0x136   :  { %v324_v19 = vpop.f32.mrf.mxu0 }
 0x137   :  { %v325_v20 = vadd.f32 %v417_v18, %v324_v19  ;;  %v344_v21 = vpop.f32.mrf.mxu1 }
 0x139   :  { %v345_v22 = vadd.f32 %v344_v21, %v325_v20 }
 0x13f   :  { %v364_v23 = vpop.f32.mrf.mxu2  ;;  %v384_v24 = vpop.f32.mrf.mxu3 }
 0x140   :  { %v365_v25 = vadd.f32 %v364_v23, %v345_v22 }
 0x142   :  { %v385_v26 = vadd.f32 %v384_v24, %v365_v25 }
 0x144   :  { %418 = vtanh.f32 %v385_v26 }
 0x14a   :  { %v419_v27 = vpop.eup %418 }
 0x14b   :  { %388 = vst [vmem:[#allocation10] sm:$0xff] %v419_v27 }
 0x14c   :  { %399 = dma.vmem_to_hbm [thread:$0]  %s395_s16, 128, %s397_s19, [#allocation4]  }
 0x14d   :  { %546 = dma.done.wait [#allocation4], 128  }
 0x14e   :  { %547 = vsyncadd [#allocation4], 4294967168 }
 0x14f   :  { %404 = vsyncpa [#allocation3], 1 }
 0x150   :  { %405 = vsyncpa [#allocation6], 1 }
 0x151   :  { %406 = vsyncpa [#allocation9], 1 }
 0x152   :  { %407 = vsyncpa [#allocation4], 1 }

</bundles_post_ra>
